<compile_context>
chip_gen: v6e
topology: v6e:2x2x1
jax: 0.10.0
libtpu: 0.0.40
codegen_flags: <defaults>
</compile_context>

<pallas_src>
import jax
import jax.numpy as jnp
from jax import lax
from jax.experimental import pallas as pl
from jax.experimental.pallas import tpu as pltpu


def _round_up(a, b):
    return (a + b - 1) // b * b


def _patch_embed_kernel(x_ref, w_ref, b_ref, o_ref):
    # x_ref: (tm, K_pad) bf16 patch tile; w_ref: (K_pad, tn) bf16;
    # b_ref: (1, tn) f32; o_ref: (tm, tn) out_dtype.
    acc = jnp.dot(x_ref[...], w_ref[...], preferred_element_type=jnp.float32)
    o_ref[...] = (acc + b_ref[...]).astype(o_ref.dtype)


def patch_embed_forward(x, weight, bias, patch_size, *, tm=1024, tn=256,
                        compute_dtype=jnp.bfloat16, out_dtype=None,
                        out_layout="NCHW"):
    """Pallas PatchEmbed forward.

    x:      (B, C, H, W)   NCHW, matching torch
    weight: (E, C, P, P)   Conv2d weight, matching torch
    bias:   (E,) or None   Conv2d bias
    out_dtype: dtype of the kernel output (None -> x.dtype, torch parity).
               Pass jnp.bfloat16 when the consumer is a bf16 transformer block.
    out_layout:
      "NCHW" -> (B, E, H//P, W//P)     (identical to torch's self.proj(x))
      "NLC"  -> (B, (H//P)*(W//P), E)  channels-last, no output transpose
    """
    B, C, H, W = x.shape
    E = weight.shape[0]
    P = patch_size
    assert H % P == 0 and W % P == 0
    Hp, Wp = H // P, W // P
    M = B * Hp * Wp               # total number of patches
    K = C * P * P                 # flattened patch length
    out_dtype = x.dtype if out_dtype is None else out_dtype

    in_b = jnp.dtype(compute_dtype).itemsize
    out_b = jnp.dtype(out_dtype).itemsize

    # --- glue: gather non-overlapping patches into one (M, K_pad) matrix ----
    # (B,C,Hp,P,Wp,P) -> (B,Hp,Wp,C,P,P) -> (M,K); cast + K zero-pad fuse into
    # the same XLA copy, so the gather is a single HBM pass.
    K_pad = _round_up(K, 128)
    patches = x.reshape(B, C, Hp, P, Wp, P)
    patches = patches.transpose(0, 2, 4, 1, 3, 5).reshape(M, K)
    patches = patches.astype(compute_dtype)
    if K_pad != K:
        patches = jnp.pad(patches, ((0, 0), (0, K_pad - K)))

    # Conv2d weight (E,C,P,P) -> matmul weight (K,E); bias pre-cast to f32.
    w_mat = weight.reshape(E, K).T.astype(compute_dtype)
    if K_pad != K:
        w_mat = jnp.pad(w_mat, ((0, K_pad - K), (0, 0)))
    if bias is None:
        bias = jnp.zeros((E,), jnp.float32)
    b_mat = bias.reshape(1, E).astype(jnp.float32)

    # --- generation-aware VMEM budget ----------------------------------------
    try:
        vmem_cap = int(pltpu.get_tpu_info().vmem_capacity_bytes)
    except Exception:
        vmem_cap = 64 * 1024 * 1024          # conservative (v7x per-TC)
    budget = int(vmem_cap * 0.75)            # ~25% headroom for compiler scratch

    def footprint(tm_e, tn_e):
        # double-buffered input / weight / bias / output tiles
        return (2 * tm_e * K_pad * in_b
                + 2 * K_pad * tn_e * in_b
                + 2 * tn_e * 4
                + 2 * tm_e * tn_e * out_b)

    # --- M tiling: multiple of 16 (bf16 sublane pack), >=2 tiles for megacore -
    m_aligned = _round_up(M, 16)
    if m_aligned <= tm and M > 16:
        tm_eff = _round_up(pl.cdiv(M, 2), 16)   # split so both v7x TCs get work
    else:
        tm_eff = min(tm, m_aligned)

    # --- E tiling: prefer a grid-resident weight (single DMA for the grid) ----
    E_full_pad = _round_up(E, 128)
    resident = footprint(tm_eff, E_full_pad) <= budget
    if resident:
        tn_eff = E_full_pad
    else:
        tn_eff = min(_round_up(tn, 128), E_full_pad)
        while footprint(tm_eff, tn_eff) > budget and tm_eff > 16:
            tm_eff = max(16, _round_up(tm_eff // 2, 16))

    M_pad = _round_up(M, tm_eff)
    E_pad = E_full_pad if resident else _round_up(E, tn_eff)

    if M_pad != M:
        patches = jnp.pad(patches, ((0, M_pad - M), (0, 0)))
    if E_pad != E:
        w_mat = jnp.pad(w_mat, ((0, 0), (0, E_pad - E)))
        b_mat = jnp.pad(b_mat, ((0, 0), (0, E_pad - E)))

    num_m = M_pad // tm_eff
    if resident:
        grid = (num_m,)
        in_specs = [
            pl.BlockSpec((tm_eff, K_pad), lambda i: (i, 0)),   # patch tile
            pl.BlockSpec((K_pad, E_pad), lambda i: (0, 0)),    # weight: grid-constant
            pl.BlockSpec((1, E_pad), lambda i: (0, 0)),        # bias:   grid-constant
        ]
        out_specs = pl.BlockSpec((tm_eff, E_pad), lambda i: (i, 0))
        dim_sem = ("parallel",)
        weight_reads = 1
    else:
        grid = (num_m, E_pad // tn_eff)
        in_specs = [
            pl.BlockSpec((tm_eff, K_pad), lambda i, j: (i, 0)),
            pl.BlockSpec((K_pad, tn_eff), lambda i, j: (0, j)),
            pl.BlockSpec((1, tn_eff), lambda i, j: (0, j)),
        ]
        out_specs = pl.BlockSpec((tm_eff, tn_eff), lambda i, j: (i, j))
        dim_sem = ("parallel", "parallel")
        weight_reads = num_m                 # weight re-streamed per M tile

    cost = pl.CostEstimate(
        flops=2 * M_pad * K_pad * E_pad,
        transcendentals=0,
        bytes_accessed=(M_pad * K_pad * in_b
                        + weight_reads * K_pad * E_pad * in_b
                        + E_pad * 4
                        + M_pad * E_pad * out_b),
    )

    out_flat = pl.pallas_call(
        _patch_embed_kernel,
        out_shape=jax.ShapeDtypeStruct((M_pad, E_pad), out_dtype),
        grid_spec=pltpu.PrefetchScalarGridSpec(
            num_scalar_prefetch=0,
            grid=grid,
            in_specs=in_specs,
            out_specs=out_specs,
        ),
        compiler_params=pltpu.CompilerParams(
            dimension_semantics=dim_sem,
            vmem_limit_bytes=budget,
        ),
        cost_estimate=cost,
    )(patches, w_mat, b_mat)

    # Padding is zero for the common ViT configs (E % 128 == 0, tm | M), in which
    # case this slice is a no-op and the NLC reshape is metadata-only.
    if M_pad != M or E_pad != E:
        out_flat = out_flat[:M, :E]

    if out_layout == "NLC":
        # channels-last (B, num_patches, E): free reshape, no HBM transpose
        return out_flat.reshape(B, Hp * Wp, E)
    # PyTorch Conv2d layout (B, E, Hp, Wp)
    return out_flat.reshape(B, Hp, Wp, E).transpose(0, 3, 1, 2)


def _reference_conv(x, weight, bias, patch_size):
    """Plain-JAX f32 reference (strided conv), for correctness checking."""
    y = lax.conv_general_dilated(
        x, weight,
        window_strides=(patch_size, patch_size),
        padding="VALID",
        dimension_numbers=("NCHW", "OIHW", "NCHW"),
        precision=lax.Precision.HIGHEST,
    )
    return y + bias.reshape(1, -1, 1, 1)


if __name__ == "__main__":
    # Small PatchEmbed config consistent with the module:
    # img_size=16, patch_size=4, in_chans=4, embed_dim=32, batch=2
    B, C, H, W = 2, 4, 16, 16
    P = 4
    E = 32

    key = jax.random.PRNGKey(0)
    kx, kw, kb = jax.random.split(key, 3)
    x = jax.random.normal(kx, (B, C, H, W), dtype=jnp.float32)
    weight = jax.random.normal(kw, (E, C, P, P), dtype=jnp.float32) * 0.02
    bias = jax.random.normal(kb, (E,), dtype=jnp.float32) * 0.02

    # Default path: torch-parity NCHW, output in x.dtype (f32 here).
    out = jax.block_until_ready(patch_embed_forward(x, weight, bias, P))
    assert out.shape == (B, E, H // P, W // P), out.shape

    # Reference on bf16-rounded inputs (kernel computes bf16 x bf16 -> f32 acc).
    x_r = x.astype(jnp.bfloat16).astype(jnp.float32)
    w_r = weight.astype(jnp.bfloat16).astype(jnp.float32)
    ref = _reference_conv(x_r, w_r, bias, P)
    assert jnp.allclose(out, ref, atol=1e-3, rtol=1e-3), "mismatch vs conv reference"

    # Transformer-consumer path: channels-last (B, L, E), bf16 output direct from
    # the kernel (halves output HBM traffic, skips the NCHW transpose).
    out_nlc = jax.block_until_ready(
        patch_embed_forward(x, weight, bias, P, out_layout="NLC",
                            out_dtype=jnp.bfloat16))
    assert out_nlc.shape == (B, (H // P) * (W // P), E), out_nlc.shape
    ref_nlc = ref.reshape(B, E, -1).transpose(0, 2, 1)
    assert jnp.allclose(out_nlc.astype(jnp.float32), ref_nlc,
                        atol=2e-2, rtol=2e-2), "NLC/bf16 mismatch vs conv reference"

    print("KERNEL_OK")
</pallas_src>

<mosaic_0001>
module attributes {stable_mosaic.version = 11 : i64} {
  func.func @_patch_embed_kernel(%arg0: i32, %arg1: memref<16x128xbf16, #tpu.memory_space<vmem>>, %arg2: memref<128x128xbf16, #tpu.memory_space<vmem>>, %arg3: memref<1x128xf32, #tpu.memory_space<vmem>>, %arg4: memref<16x128xf32, #tpu.memory_space<vmem>>) attributes {dimension_semantics = [#tpu.dimension_semantics<parallel>], iteration_bounds = array<i64: 2>, scalar_prefetch = 0 : i64, scratch_operands = 0 : i64, tpu.core_type = #tpu.core_type<tc>, window_params = [{transform_indices = @transform_0, window_bounds = array<i64: 16, 128>}, {pipeline_mode = #tpu.pipeline_mode<synchronous>, transform_indices = @transform_1, window_bounds = array<i64: 128, 128>}, {pipeline_mode = #tpu.pipeline_mode<synchronous>, transform_indices = @transform_2, window_bounds = array<i64: 1, 128>}, {transform_indices = @transform_3, window_bounds = array<i64: 16, 128>}]} {
    %c0 = arith.constant 0 : index
    %c0_0 = arith.constant 0 : index
    %0 = vector.load %arg1[%c0, %c0_0] : memref<16x128xbf16, #tpu.memory_space<vmem>>, vector<16x128xbf16>
    %c0_1 = arith.constant 0 : index
    %c0_2 = arith.constant 0 : index
    %1 = vector.load %arg2[%c0_1, %c0_2] : memref<128x128xbf16, #tpu.memory_space<vmem>>, vector<128x128xbf16>
    %cst = arith.constant dense<0.000000e+00> : vector<16x128xf32>
    %2 = tpu.matmul %0, %1, %cst {dimension_numbers = #tpu.dot_dimension_numbers<[1], [0], [0], [1], [0, 0, 1, 1], [], []>} : vector<16x128xbf16>, vector<128x128xbf16>, vector<16x128xf32> -> vector<16x128xf32>
    %c0_3 = arith.constant 0 : index
    %c0_4 = arith.constant 0 : index
    %3 = vector.load %arg3[%c0_3, %c0_4] : memref<1x128xf32, #tpu.memory_space<vmem>>, vector<1x128xf32>
    %4 = vector.broadcast %3 : vector<1x128xf32> to vector<16x128xf32>
    %5 = arith.addf %2, %4 : vector<16x128xf32>
    %c0_5 = arith.constant 0 : index
    %c0_6 = arith.constant 0 : index
    %6 = vector.load %arg4[%c0_5, %c0_6] : memref<16x128xf32, #tpu.memory_space<vmem>>, vector<16x128xf32>
    tpu.vector_store %arg4[%c0_5, %c0_6], %5 {strides = array<i32>} : memref<16x128xf32, #tpu.memory_space<vmem>>, vector<16x128xf32>,
    return
  }
  func.func @transform_0(%arg0: i32) -> (i32, i32) {
    %c0_i32 = arith.constant 0 : i32
    %c0_i32_0 = arith.constant 0 : i32
    return %arg0, %c0_i32 : i32, i32
  }
  func.func @transform_1(%arg0: i32) -> (i32, i32) {
    %c0_i32 = arith.constant 0 : i32
    %c0_i32_0 = arith.constant 0 : i32
    %c0_i32_1 = arith.constant 0 : i32
    return %c0_i32, %c0_i32_0 : i32, i32
  }
  func.func @transform_2(%arg0: i32) -> (i32, i32) {
    %c0_i32 = arith.constant 0 : i32
    %c0_i32_0 = arith.constant 0 : i32
    %c0_i32_1 = arith.constant 0 : i32
    return %c0_i32, %c0_i32_0 : i32, i32
  }
  func.func @transform_3(%arg0: i32) -> (i32, i32) {
    %c0_i32 = arith.constant 0 : i32
    %c0_i32_0 = arith.constant 0 : i32
    return %arg0, %c0_i32 : i32, i32
  }
}

</mosaic_0001>

<bundles_post_ra>
// kernel: tpu_custom_call.1
= control target key start
LH: loop header
LB: loop body
LE: loop exit
PB: predicated region body
PF: predicated region fallthrough
CT: control target
= control target key end

     0   :  { %8 = vsyncpa [#allocation3], 0  ;;  %s898_s0 = inlined_call_operand.hbm [shape: bf16[32,128], index: 0, kind: input, shape index: {}]   ;;  %s899_s1 = inlined_call_operand.hbm [shape: bf16[128,128], index: 1, kind: input, shape index: {}]   ;;  %s900_s2 = inlined_call_operand.vmem [shape: f32[1,128], index: 2, kind: input, shape index: {}]   ;;  %s901_s3 = inlined_call_operand.hbm [shape: f32[32,128], index: 3, kind: output, shape index: {}]  }
   0x1   :  { %10 = vsyncpa [#allocation3 + $0x1], 0 }
   0x2   :  { %11 = vsyncpa [#allocation6], 0 }
   0x3   :  { %12 = vsyncpa [#allocation4], 0 }
   0x4   :  { %14 = vsyncpa [#allocation4 + $0x1], 0  ;;  %s708_s12 = smov 0   ;;  %s710_s13 = smov 0  }
   0x5   :  { %s712_s14 = smov 0   ;;  %s714_s15 = smov 0  }
   0x6 LB: > { %s729_s16 = sadd.s32 4294967295, %s677_s15   ;;  %s426_s17 = sadd.s32 4294967294, %s677_s15   ;;  %s677_s15 = sphi %s714_s15, %s923_s15   ;;  %s673_s14 = sphi %s712_s14, %s922_s14   ;;  %s669_s13 = sphi %s710_s13, %s921_s13   ;;  %s665_s12 = sphi %s708_s12, %s920_s12  }
   0x7   : > { %p40_p0 = scmp.ne.s32.totalorder %s669_s13, %s665_s12  ;;  %p902_p1 = scmp.eq.s32.totalorder %s729_s16, 0 }
   0x8   : > { %p112_p3 = scmp.eq.s32.totalorder %s426_s17, 1  ;;  %p427_p5 = scmp.ge.s32.totalorder %s677_s15, 1 }
   0x9   : > { %p738_p4 = por %p902_p1, %p40_p0  ;;  %p119_p7 = scmp.lt.s32.totalorder %s677_s15, 3 }
   0xa   : > { %p743_p6 = por %p112_p3, %p40_p0  ;;  %s679_s21 = smov [#allocation5]  }
   0xb   : > { %s906_s18 = scalar_select %p738_p4, 1, 0 }
   0xc   : > { %s907_s19 = scalar_select %p743_p6, 1, 0 }
   0xd   : > { %p748_p8 = pnand %p427_p5, %p119_p7  ;;  %s131_s22 = sshll.u32 %s679_s21, 4  ;;  %s132_s22 = int_to_ptr.vmem [resolvable:$true] %s131_s22 }
   0xe   : > { %s762_s24 = sadd.s32 1, %s677_s15   ;;  %s27_s25 = sadd.s32 1, %s673_s14 }
   0xf   : > { %s908_s20 = scalar_select %p748_p8, 1, 0 }
  0x10   : > { %p491_p9 = pneg %p748_p8  ;;  %s24_s26 = ssub.s32 %s677_s15, %s762_s24 }
  0x11   : > { %s566_s27 = scalar_lea.vmem %s132_s22, 1024  ;;  %p574_p5 = scmp.lt.s32.totalorder %s132_s22, %s132_s22 }
  0x12   : > { %p757_p11 = pnand %p491_p9, %p902_p1  ;;  %p567_p13 = scmp.ne.s32.totalorder %s132_s22, %s566_s27 }
  0x13   : > { %p575_p7 = scmp.lt.s32.totalorder %s566_s27, %s566_s27 }
  0x14   : > { %p557_p12 = pneg %p757_p11 }
  0x15   : > { %p576_p10 = por %p575_p7, %p574_p5 }
  0x16   : > { %p569_p0 = pnand %p567_p13, %p557_p12 }
  0x18   : > { %p570_p3 = pneg %p569_p0 }
  0x1a   : > { %p577_p2 = pnand %p576_p10, %p570_p3 }
  0x1c   : > { %580 = shalt.err (!%p577_p2)
}
  0x1d   : > { %s680_s28 = smov 64   ;;  %s681_s29 = smov 4  }
  0x1e   : > { %494 = dma.hbm_to_vmem [thread:$0]  (!%p757_p11), %s899_s1, 1024, %s132_s22, [#allocation6], %s680_s28, %s680_s28, %s681_s29  }
  0x1f   : > { %p25_p2 = scmp.eq.s32.totalorder %s24_s26, 0  ;;  %p34_p9 = scmp.ne.s32.totalorder %s673_s14, %s669_s13 }
  0x20   : > { %p35_p10 = scmp.eq.s32.totalorder %s677_s15, 0  ;;  %p504_p12 = scmp.lt.s32.totalorder %s677_s15, 2 }
  0x21   : > { %s782_s5 = scalar_select %p25_p2, %s673_s14, %s27_s25  }
  0x22   : > { %p36_p13 = por %p35_p10, %p34_p9  ;;  %p910_p0 = scmp.eq.s32.totalorder %s729_s16, 1 }
  0x23   : > { %s148_s7 = sand.u32 1, %s673_s14   ;;  %s452_s8 = sshll.u32 %s677_s15, 7 }
  0x24   : > { %p786_p3 = por %p910_p0, %p34_p9  ;;  %s430_s9 = sshll.u32 %s148_s7, 3 }
  0x25   : > { %s795_s17 = scalar_lea.hbm %s898_s0, %s452_s8  ;;  %s152_s21 = scalar_lea.vmem [#allocation2], %s430_s9 }
  0x26   : > { %s911_s6 = scalar_select %p786_p3, 1, 0 }
  0x27   : > { %s159_s22 = sshll.u32 %s152_s21, 4  ;;  %p797_p11 = pnand %p504_p12, %p36_p13  ;;  %s801_s22 = int_to_ptr.vmem [resolvable:$true] %s159_s22 }
  0x28   : > { %s803_s25 = scalar_lea.sflag [#allocation3], %s148_s7  ;;  %s581_s26 = scalar_lea.hbm %s795_s17, 128 }
  0x29   : > { %p582_p5 = scmp.ne.s32.totalorder %s795_s17, %s581_s26  ;;  %p583_p7 = pneg %p797_p11 }
  0x2a   : > { %s586_s4 = scalar_lea.hbm %s898_s0, 256  ;;  %p587_p10 = scmp.lt.s32.totalorder %s795_s17, %s898_s0 }
  0x2b   : > { %p584_p2 = pnand %p583_p7, %p582_p5  ;;  %p588_p12 = scmp.lt.s32.totalorder %s586_s4, %s581_s26 }
  0x2d   : > { %p585_p9 = pneg %p584_p2  ;;  %p589_p13 = por %p588_p12, %p587_p10 }
  0x2f   : > { %p590_p0 = pnand %p589_p13, %p585_p9 }
  0x31   : > { %593 = shalt.err (!%p590_p0)
}
  0x32   : > { %s594_s7 = scalar_lea.vmem %s801_s22, 128  ;;  %s682_s10 = smov [#allocation2]  }
  0x33   : > { %p595_p1 = scmp.ne.s32.totalorder %s801_s22, %s594_s7  ;;  %s599_s11 = sshll.u32 %s682_s10, 4  ;;  %s600_s11 = int_to_ptr.vmem [resolvable:$false] %s599_s11 }
  0x34   : > { %s601_s21 = scalar_lea.vmem %s600_s11, 256  ;;  %p602_p2 = scmp.lt.s32.totalorder %s801_s22, %s600_s11 }
  0x35   : > { %p597_p6 = pnand %p595_p1, %p583_p7  ;;  %p603_p3 = scmp.lt.s32.totalorder %s601_s21, %s594_s7 }
  0x37   : > { %p598_p5 = pneg %p597_p6  ;;  %p604_p4 = por %p603_p3, %p602_p2 }
  0x39   : > { %p605_p8 = pnand %p604_p4, %p598_p5 }
  0x3b   : > { %608 = shalt.err (!%p605_p8)
}
  0x3c   : > { %498 = dma.hbm_to_vmem [thread:$0]  (!%p797_p11), %s795_s17, 128, %s801_s22, %s803_s25, %s680_s28, %s680_s28, %s681_s29  }
  0x3d   : > { %p913_p1 = scmp.ne.s32.totalorder %s908_s20, 0 }
  0x3e   : > { %s830_s26 = sand.u32 (!%p913_p1), 1, %s669_s13   ;;  %p914_p4 = scmp.ne.s32.totalorder (!%p913_p1), %s906_s18, 0 }
  0x3f   : > { %171 = sbr.rel (%p913_p1) target bundleno = 318 (0x13e), region = 32  ;;  %s434_s27 = sshll.u32 (!%p913_p1), %s830_s26, 3 }
  0x40   : > { %s174_s30 = scalar_lea.sflag (!%p913_p1), [#allocation3], %s830_s26  ;;  %s834_s4 = scalar_lea.vmem (!%p913_p1), [#allocation2], %s434_s27 }
  0x44   : > { %652 = dma.done.wait (%p914_p4), %s174_s30, 128  }
  0x45   : > { %654 = vsyncadd (%p914_p4), %s174_s30, 4294967168  ;;  %p915_p6 = scmp.eq.s32.totalorder %s729_s16, 0 }
  0x47   : > { %656 = dma.done.wait (%p915_p6), [#allocation6], 1024   ;;  %p916_p8 = pmov %p915_p6 }
  0x48   : > { %v683_v0 = vmov 0.0   ;;  %vm684_vm0 = vmmov 0   ;;  %v546_v1 = vld [vmem:[#allocation5 + $0x38] sm:$0xff]   ;;  %v547_v2 = vld [vmem:[#allocation5 + $0x30] sm:$0xff]   ;;  %v548_v3 = vld [vmem:[#allocation5 + $0x28] sm:$0xff]   ;;  %s436_s18 = sshll.u32 %s830_s26, 4 }
  0x49   : > { %658 = vsyncadd (%p916_p8), [#allocation6], 4294966272  ;;  %463 = vmatprep.subr.bf16.mxu0 %v683_v0  ;;  %479 = vmatprep.mubr.msk.bf16.mxu0 %vm684_vm0, %v683_v0  ;;  %v549_v4 = vld [vmem:[#allocation5 + $0x20] sm:$0xff]   ;;  %v550_v5 = vld [vmem:[#allocation5 + $0x18] sm:$0xff]   ;;  %s203_s29 = scalar_lea.vmem [#allocation7], %s436_s18  ;;  %s453_s22 = sshll.u32 %s729_s16, 8 }
  0x4a   : > { %464 = vmatpush3.bf16.msra.mxu0 %v546_v1  ;;  %v551_v6 = vld [vmem:[#allocation5 + $0x10] sm:$0xff]   ;;  %v552_v7 = vld [vmem:[#allocation5 + $0x8] sm:$0xff]   ;;  %v553_v8 = vld [vmem:[#allocation5] sm:$0xff]   ;;  %s343_s17 = sshll.u32 %s203_s29, 4  ;;  %s855_s8 = scalar_lea.hbm %s901_s3, %s453_s22  ;;  %s850_s17 = int_to_ptr.vmem [resolvable:$true] %s343_s17 }
  0x4b   : > { %465 = vmatprep.subr.bf16.mxu0 %v683_v0  ;;  %v554_v9 = vld [vmem:[%s834_s4] sm:$0xff]   ;;  %s330_s9 = scalar_lea.sflag [#allocation4], %s830_s26  ;;  %s609_s7 = scalar_lea.vmem %s850_s17, 256 }
  0x4c   : > { %v437_v10 = vld [vmem:[%s900_s2] ss:$0 sm:$0xff]  ;;  %p610_p3 = scmp.ne.s32.totalorder %s850_s17, %s609_s7  ;;  %p917_p11 = scmp.ne.s32.totalorder %s911_s6, 0 }
  0x4d   : > { %s685_s16 = smov [#allocation7]  }
  0x4e   : > { %466 = vmatpush3.bf16.msra.mxu0 %v547_v2  ;;  %p611_p7 = pnand %p610_p3, %p917_p11  ;;  %s613_s10 = sshll.u32 %s685_s16, 4  ;;  %s614_s10 = int_to_ptr.vmem [resolvable:$false] %s613_s10 }
  0x4f   : > { %467 = vmatprep.subr.bf16.mxu0 %v683_v0  ;;  %s615_s11 = scalar_lea.vmem %s614_s10, 512  ;;  %p616_p10 = scmp.lt.s32.totalorder %s850_s17, %s614_s10 }
  0x50   : > { %p612_p9 = pneg %p611_p7  ;;  %p617_p12 = scmp.lt.s32.totalorder %s615_s11, %s609_s7 }
  0x52   : > { %468 = vmatpush3.bf16.msra.mxu0 %v548_v3  ;;  %p618_p13 = por %p617_p12, %p616_p10 }
  0x53   : > { %469 = vmatprep.subr.bf16.mxu0 %v683_v0 }
  0x54   : > { %p619_p0 = pnand %p618_p13, %p612_p9 }
  0x56   : > { %470 = vmatpush3.bf16.msra.mxu0 %v549_v4 }
  0x57   : > { %471 = vmatprep.subr.bf16.mxu0 %v683_v0 }
  0x5a   : > { %472 = vmatpush3.bf16.msra.mxu0 %v550_v5 }
  0x5b   : > { %473 = vmatprep.subr.bf16.mxu0 %v683_v0 }
  0x5e   : > { %474 = vmatpush3.bf16.msra.mxu0 %v551_v6 }
  0x5f   : > { %475 = vmatprep.subr.bf16.mxu0 %v683_v0 }
  0x62   : > { %476 = vmatpush3.bf16.msra.mxu0 %v552_v7 }
  0x63   : > { %477 = vmatprep.subr.bf16.mxu0 %v683_v0 }
  0x66   : > { %478 = vmatpush3.bf16.msra.mxu0 %v553_v8 }
  0x69   : > { %480 = vmatmul.mubr.bf16.vlgmr.msra.gmra.mxu0 %v554_v9 }
 0x129   : > { %v320_v11 = vpop.f32.mrf.mxu0 }
 0x12a   : > { %v321_v12 = vadd.f32 %v437_v10, %v320_v11 }
 0x12b   : > { %v481_v13 = vpop.f32.mrf.mxu0 }
 0x12c   : > { %327 = vst [vmem:[%s203_s29] sm:$0xff] %v321_v12 }
 0x12d   : > { %v323_v14 = vpop.f32.mrf.mxu0 }
 0x12e   : > { %v324_v15 = vadd.f32 %v437_v10, %v323_v14 }
 0x12f   : > { %v482_v16 = vpop.f32.mrf.mxu0 }
 0x130   : > { %328 = vst [vmem:[%s203_s29 + $0x8] sm:$0xff] %v324_v15 }
 0x131   : > { %622 = shalt.err (!%p619_p0)
}
 0x132   : > { %s623_s21 = scalar_lea.hbm %s855_s8, 256  ;;  %s627_s4 = scalar_lea.hbm %s901_s3, 512 }
 0x133   : > { %p624_p5 = scmp.ne.s32.totalorder %s855_s8, %s623_s21  ;;  %p628_p4 = scmp.lt.s32.totalorder %s855_s8, %s901_s3 }
 0x134   : > { %p629_p6 = scmp.lt.s32.totalorder %s627_s4, %s623_s21 }
 0x135   : > { %p625_p2 = pnand %p624_p5, %p917_p11 }
 0x136   : > { %p630_p8 = por %p629_p6, %p628_p4 }
 0x137   : > { %p626_p1 = pneg %p625_p2 }
 0x139   : > { %p631_p3 = pnand %p630_p8, %p626_p1 }
 0x13b   : > { %634 = shalt.err (!%p631_p3)
}
 0x13c   : > { %s686_s28 = smov 128   ;;  %s687_s29 = smov 8  }
 0x13d   : > { %489 = dma.vmem_to_hbm [thread:$0]  (%p917_p11), %s850_s17, 256, %s855_s8, %s330_s9, %s686_s28, %s686_s28, %s687_s29  }
 0x13e PF: > { %s358_s22 = sand.u32 1, %s665_s12   ;;  %p918_p7 = scmp.ne.s32.totalorder %s907_s19, 0 }
 0x13f   : > { %p919_p9 = scmp.ge.s32.totalorder %s677_s15, 2  ;;  %s359_s23 = scalar_lea.sflag [#allocation4], %s358_s22 }
 0x141   : > { %p500_p10 = pnand %p919_p9, %p918_p7 }
 0x143   : > { %p501_p12 = pneg %p500_p10 }
 0x145   : > { %660 = dma.done.wait (%p501_p12), %s359_s23, 256  }
 0x146   : > { %662 = vsyncadd (%p501_p12), %s359_s23, 4294967040  ;;  %p17_p13 = scmp.ge.s32.totalorder %s762_s24, 4   ;;  %s920_s12 = smov %s669_s13 }
 0x147   : > { %s921_s13 = smov %s673_s14  ;;  %s922_s14 = smov %s782_s5 }
 0x148   : > { %s923_s15 = smov %s762_s24  ;;  %19 = sbr.rel (!%p17_p13) target bundleno = 6 (0x6), region = 81 }
 0x14d   :  { %364 = vsyncpa [#allocation3], 1 }
 0x14e   :  { %366 = vsyncpa [#allocation3 + $0x1], 1 }
 0x14f   :  { %367 = vsyncpa [#allocation6], 1 }
 0x150   :  { %368 = vsyncpa [#allocation4], 1 }
 0x151   :  { %370 = vsyncpa [#allocation4 + $0x1], 1 }

</bundles_post_ra>
